<compile_context>
chip_gen: v6e
topology: v6e:2x2x1
jax: 0.10.0
libtpu: 0.0.40
codegen_flags: <defaults>
</compile_context>

<pallas_src>
import functools

import jax
import jax.numpy as jnp
from jax import lax
from jax.experimental import pallas as pl
from jax.experimental.pallas import tpu as pltpu


def _round_up(x, m):
    return ((x + m - 1) // m) * m


# ----------------------------- fused Pallas kernel -----------------------------

def _dgm_fused_kernel(x_ref, fw_ref, fb_ref,
                      wc_ref, wh_ref, b4_ref,
                      ow_ref, ob_ref,
                      o_ref,
                      s_ref,
                      *, lp, ip, layer_count):
    """One grid step = the complete DGM forward for one batch tile.

    s_ref (VMEM f32, shape (TB, lp+ip)): columns [0:lp] hold the running state
    S, columns [lp:lp+ip] hold the zero-padded input X, so the gate matmul is a
    single [S|X] @ [[Wz|Wg|Wr|0]; [Uz|Ug|Ur|Uh]] MXU op per layer.
    All layer weights are VMEM-resident (constant index_map, DMA'd once).
    """
    bf16 = jnp.bfloat16

    # --- stage X into the scratch, run the first Linear+ReLU -----------------
    X = x_ref[...]                                           # (TB, ip) f32
    s_ref[:, lp:] = X                                        # written once per tile
    h0 = jnp.dot(X.astype(bf16), fw_ref[...],
                 preferred_element_type=jnp.float32)         # (TB, lp)
    s_ref[:, :lp] = jnp.maximum(h0 + fb_ref[...], 0.0)

    # --- DGM-LSTM layers (weights resident, state lives in VMEM scratch) -----
    def layer_body(l, carry):
        state = s_ref[...].astype(bf16)                      # [S|X], (TB, lp+ip)
        pre = (jnp.dot(state, wc_ref[l],
                       preferred_element_type=jnp.float32)
               + b4_ref[l])                                  # (TB, 4*lp), f32
        S = s_ref[:, :lp]                                    # f32 state view
        # lp % 128 == 0 -> every gate slice is a lane-aligned free view;
        # per-gate tanh avoids a (TB, 3*lp) temp + re-slices.
        Z = jnp.tanh(pre[:, 0 * lp:1 * lp])
        G = jnp.tanh(pre[:, 1 * lp:2 * lp])
        R = jnp.tanh(pre[:, 2 * lp:3 * lp])
        # X@Uh + bh already sits in pre[:, 3lp:] (zero block in the packed
        # weight routes it there); only (S*R)@Wh remains.
        H = jnp.tanh(pre[:, 3 * lp:]
                     + jnp.dot((S * R).astype(bf16), wh_ref[l],
                               preferred_element_type=jnp.float32))
        s_ref[:, :lp] = (1.0 - G) * H + Z * S
        return carry

    lax.fori_loop(0, layer_count, layer_body, 0, unroll=True)

    # --- output Linear, written as a lane-dense (TB, OUT_PAD) slab ------------
    o_ref[...] = (jnp.dot(s_ref[:, :lp].astype(bf16), ow_ref[...],
                          preferred_element_type=jnp.float32)
                  + ob_ref[...])


# ----------------------------- wrapper -----------------------------

def dgm_forward(x, packed, *, batch_tile=None):
    """Fused DGM forward.  `packed` comes from pack_dgm_params()."""
    d = packed["dims"]
    L, Lp, in_dim, ip = d["L"], d["Lp"], d["in_dim"], d["ip"]
    LC, out_dim, out_pad = d["LC"], d["out_dim"], d["out_pad"]

    batch = x.shape[0]
    assert x.shape[1] == in_dim
    assert LC >= 1, "fused kernel expects at least one DGM_LSTM layer"

    # Batch tiling: aim for >=2 tiles (feeds both v7x TensorCores through the
    # "parallel" batch axis) while keeping tiles 8-sublane aligned, <=256 rows.
    if batch_tile is None:
        if batch <= 512:
            batch_tile = max(8, _round_up((batch + 1) // 2, 8))
        else:
            batch_tile = 256
    padded_batch = _round_up(batch, batch_tile)
    nb = padded_batch // batch_tile

    # Pad input to (padded_batch, ip) with zeros (zero rows/cols are inert).
    xp = jnp.zeros((padded_batch, ip), jnp.float32).at[:batch, :in_dim].set(x)

    # --- VMEM budget: resident weights must fit even on v7x (64 MiB / core) ---
    def nbytes(a):
        return a.size * a.dtype.itemsize

    weight_bytes = (nbytes(packed["WC"]) + nbytes(packed["WH"]) + nbytes(packed["B4"])
                    + nbytes(packed["first_w"]) + nbytes(packed["first_b"])
                    + nbytes(packed["ow"]) + nbytes(packed["ob"]))
    tile_bytes = (2 * batch_tile * ip * 4            # x tile, double buffered
                  + 2 * batch_tile * out_pad * 4     # out tile, double buffered
                  + batch_tile * (Lp + ip) * 4)      # [S|X] state scratch
    needed = 2 * weight_bytes + tile_bytes           # conservative 2x on weights
    if needed > 48 * 1024 * 1024:
        # TODO(synk): streaming fallback (layer grid axis) for weight stacks too
        # large for v7x's 64 MiB VMEM; not needed at these problem sizes.
        raise NotImplementedError("DGM weight stack too large for VMEM-resident kernel")
    vmem_limit = int(min(max(needed + (8 << 20), 32 << 20), 100 << 20))

    kernel = functools.partial(_dgm_fused_kernel, lp=Lp, ip=ip, layer_count=LC)

    out = pl.pallas_call(
        kernel,
        out_shape=jax.ShapeDtypeStruct((padded_batch, out_pad), jnp.float32),
        grid=(nb,),
        in_specs=[
            pl.BlockSpec((batch_tile, ip), lambda b: (b, 0)),            # x (f32)
            pl.BlockSpec((ip, Lp), lambda b: (0, 0)),                    # first_w (bf16)
            pl.BlockSpec((1, Lp), lambda b: (0, 0)),                     # first_b (f32)
            pl.BlockSpec((LC, Lp + ip, 4 * Lp), lambda b: (0, 0, 0)),    # [[W3];[U4]] stack (bf16)
            pl.BlockSpec((LC, Lp, Lp), lambda b: (0, 0, 0)),             # Wh stack (bf16)
            pl.BlockSpec((LC, 1, 4 * Lp), lambda b: (0, 0, 0)),          # bias stack (f32)
            pl.BlockSpec((Lp, out_pad), lambda b: (0, 0)),               # out_w (bf16)
            pl.BlockSpec((1, out_pad), lambda b: (0, 0)),                # out_b (f32)
        ],
        out_specs=pl.BlockSpec((batch_tile, out_pad), lambda b: (b, 0)),
        scratch_shapes=[pltpu.VMEM((batch_tile, Lp + ip), jnp.float32)],
        compiler_params=pltpu.CompilerParams(
            dimension_semantics=("parallel",),
            vmem_limit_bytes=vmem_limit),
    )(xp,
      packed["first_w"], packed["first_b"],
      packed["WC"], packed["WH"], packed["B4"],
      packed["ow"], packed["ob"])

    return out[:batch, :out_dim]


# ----------------------------- parameter init / packing -----------------------------

def init_dgm_params(key, in_dim, layer_size, out_dim, layer_count):
    """Deterministic parameter init (shapes match the PyTorch __init__)."""
    keys = jax.random.split(key, 3 + layer_count)

    def mat(k, shape, scale):
        return (scale * jax.random.normal(k, shape)).astype(jnp.float32)

    params = {
        "first_w": mat(keys[0], (in_dim, layer_size), 0.5),
        "first_b": mat(keys[1], (1, layer_size), 0.1),
        "out_w": mat(keys[2], (layer_size, out_dim), 0.5),
        "out_b": jnp.zeros((1, out_dim), jnp.float32),
        "layers": [],
    }
    for li in range(layer_count):
        lk = jax.random.split(keys[3 + li], 8)
        layer = {
            "uz": mat(lk[0], (in_dim, layer_size), 0.3),
            "ug": mat(lk[1], (in_dim, layer_size), 0.3),
            "ur": mat(lk[2], (in_dim, layer_size), 0.3),
            "uh": mat(lk[3], (in_dim, layer_size), 0.3),
            "wz": mat(lk[4], (layer_size, layer_size), 0.3),
            "wg": mat(lk[5], (layer_size, layer_size), 0.3),
            "wr": mat(lk[6], (layer_size, layer_size), 0.3),
            "wh": mat(lk[7], (layer_size, layer_size), 0.3),
            # biases init to ones, as in DGM_LSTM.__init__
            "bz": jnp.ones((1, layer_size), jnp.float32),
            "bg": jnp.ones((1, layer_size), jnp.float32),
            "br": jnp.ones((1, layer_size), jnp.float32),
            "bh": jnp.ones((1, layer_size), jnp.float32),
        }
        params["layers"].append(layer)
    return params


def pack_dgm_params(params, out_dim):
    """Pack params into the fused / stacked / lane-padded kernel layout.

    layer_size is zero-padded to Lp = round_up(L, 128); in_dim to ip = round_up(in_dim, 8).
    Per layer the combined weight is
        rows [0:Lp]      = [Wz | Wg | Wr | 0 ]      (consumed by S)
        rows [Lp:Lp+ip]  = [Uz | Ug | Ur | Uh]      (consumed by X)
    so [S|X] @ WC gives all four gate pre-activations in one matmul; zero
    padding keeps the padded state columns exactly zero through every layer.
    """
    in_dim, L = params["first_w"].shape
    Lp = _round_up(L, 128)
    ip = _round_up(in_dim, 8)
    LC = len(params["layers"])
    out_pad = _round_up(out_dim, 128)

    def pad2(a, r, c):
        return jnp.zeros((r, c), jnp.float32).at[:a.shape[0], :a.shape[1]].set(a)

    fw = pad2(params["first_w"], ip, Lp).astype(jnp.bfloat16)
    fb = pad2(params["first_b"], 1, Lp)                       # f32

    wcs, whs, b4s = [], [], []
    for p in params["layers"]:
        top = jnp.concatenate([pad2(p["wz"], Lp, Lp), pad2(p["wg"], Lp, Lp),
                               pad2(p["wr"], Lp, Lp), jnp.zeros((Lp, Lp), jnp.float32)],
                              axis=1)                         # (Lp, 4Lp)
        bot = jnp.concatenate([pad2(p["uz"], ip, Lp), pad2(p["ug"], ip, Lp),
                               pad2(p["ur"], ip, Lp), pad2(p["uh"], ip, Lp)],
                              axis=1)                         # (ip, 4Lp)
        wcs.append(jnp.concatenate([top, bot], axis=0))       # (Lp+ip, 4Lp)
        whs.append(pad2(p["wh"], Lp, Lp))
        b4s.append(jnp.concatenate([pad2(p["bz"], 1, Lp), pad2(p["bg"], 1, Lp),
                                    pad2(p["br"], 1, Lp), pad2(p["bh"], 1, Lp)], axis=1))

    WC = jnp.stack(wcs).astype(jnp.bfloat16)                  # (LC, Lp+ip, 4Lp)
    WH = jnp.stack(whs).astype(jnp.bfloat16)                  # (LC, Lp, Lp)
    B4 = jnp.stack(b4s)                                       # (LC, 1, 4Lp) f32

    ow = pad2(params["out_w"], Lp, out_pad).astype(jnp.bfloat16)
    ob = pad2(params["out_b"], 1, out_pad)                    # f32

    return {
        "first_w": fw, "first_b": fb,
        "WC": WC, "WH": WH, "B4": B4,
        "ow": ow, "ob": ob,
        "dims": dict(L=L, Lp=Lp, in_dim=in_dim, ip=ip, LC=LC,
                     out_dim=out_dim, out_pad=out_pad),
    }


# ----------------------------- pure-JAX references -----------------------------

def dgm_forward_ref(x, params):
    """Full-f32 reference (matches the PyTorch module semantics)."""
    hi = jax.lax.Precision.HIGHEST
    dot = functools.partial(jnp.dot, precision=hi)
    temp = jax.nn.relu(dot(x, params["first_w"]) + params["first_b"])
    for p in params["layers"]:
        S = temp
        Z = jnp.tanh(dot(x, p["uz"]) + dot(S, p["wz"]) + p["bz"])
        G = jnp.tanh(dot(x, p["ug"]) + dot(S, p["wg"]) + p["bg"])
        R = jnp.tanh(dot(x, p["ur"]) + dot(S, p["wr"]) + p["br"])
        H = jnp.tanh(dot(x, p["uh"]) + dot(S * R, p["wh"]) + p["bh"])
        temp = (1.0 - G) * H + Z * S
    return dot(temp, params["out_w"]) + params["out_b"]


def dgm_forward_ref_bf16(x, params):
    """Reference with the kernel's matmul numerics: bf16 operands, f32 accumulation."""
    bf = jnp.bfloat16

    def bdot(a, b):
        return jnp.dot(a.astype(bf), b.astype(bf), preferred_element_type=jnp.float32)

    temp = jax.nn.relu(bdot(x, params["first_w"]) + params["first_b"])
    for p in params["layers"]:
        S = temp
        Z = jnp.tanh(bdot(x, p["uz"]) + bdot(S, p["wz"]) + p["bz"])
        G = jnp.tanh(bdot(x, p["ug"]) + bdot(S, p["wg"]) + p["bg"])
        R = jnp.tanh(bdot(x, p["ur"]) + bdot(S, p["wr"]) + p["br"])
        H = jnp.tanh(bdot(x, p["uh"]) + bdot(S * R, p["wh"]) + p["bh"])
        temp = (1.0 - G) * H + Z * S
    return bdot(temp, params["out_w"]) + params["out_b"]


# ----------------------------- main -----------------------------

if __name__ == "__main__":
    # TODO(synk): training utilities (dynamic_fit/fit/predict/derivs) are
    # optimizer/autograd driver code, not part of the forward pass; only
    # DGM.forward is implemented as a kernel.
    batch = 8
    in_dim = 4
    layer_size = 32
    out_dim = 2
    layer_count = 3

    key = jax.random.PRNGKey(0)
    kx, kp = jax.random.split(key)
    x = jax.random.normal(kx, (batch, in_dim), dtype=jnp.float32)
    params = init_dgm_params(kp, in_dim, layer_size, out_dim, layer_count)
    packed = pack_dgm_params(params, out_dim)

    fwd = jax.jit(lambda xx: dgm_forward(xx, packed))
    out = jax.block_until_ready(fwd(x))
    assert out.shape == (batch, out_dim)
    assert bool(jnp.all(jnp.isfinite(out)))

    # Tight correctness check: pure-JAX reference with the same bf16-operand /
    # f32-accumulate matmul numerics as the kernel.
    ref_bf16 = dgm_forward_ref_bf16(x, params)
    assert jnp.allclose(out, ref_bf16, atol=2e-3, rtol=2e-3), "mismatch vs bf16-matched reference"

    # Sanity bound vs the full-f32 reference (bf16 MXU operands drift slightly).
    ref_f32 = dgm_forward_ref(x, params)
    assert jnp.allclose(out, ref_f32, atol=1e-1, rtol=1e-1), "drift vs f32 reference too large"

    print("KERNEL_OK")
</pallas_src>

<mosaic_0001>
module attributes {stable_mosaic.version = 11 : i64} {
  func.func @_dgm_fused_kernel(%arg0: i32, %arg1: memref<8x8xf32, #tpu.memory_space<vmem>>, %arg2: memref<8x128xbf16, #tpu.memory_space<vmem>>, %arg3: memref<1x128xf32, #tpu.memory_space<vmem>>, %arg4: memref<3x136x512xbf16, #tpu.memory_space<vmem>>, %arg5: memref<3x128x128xbf16, #tpu.memory_space<vmem>>, %arg6: memref<3x1x512xf32, #tpu.memory_space<vmem>>, %arg7: memref<128x128xbf16, #tpu.memory_space<vmem>>, %arg8: memref<1x128xf32, #tpu.memory_space<vmem>>, %arg9: memref<8x128xf32, #tpu.memory_space<vmem>>, %arg10: memref<8x136xf32, #tpu.memory_space<vmem>>) attributes {dimension_semantics = [#tpu.dimension_semantics<parallel>], iteration_bounds = array<i64: 1>, scalar_prefetch = 0 : i64, scratch_operands = 1 : i64, tpu.core_type = #tpu.core_type<tc>, window_params = [{transform_indices = @transform_0, window_bounds = array<i64: 8, 8>}, {pipeline_mode = #tpu.pipeline_mode<synchronous>, transform_indices = @transform_1, window_bounds = array<i64: 8, 128>}, {pipeline_mode = #tpu.pipeline_mode<synchronous>, transform_indices = @transform_2, window_bounds = array<i64: 1, 128>}, {pipeline_mode = #tpu.pipeline_mode<synchronous>, transform_indices = @transform_3, window_bounds = array<i64: 3, 136, 512>}, {pipeline_mode = #tpu.pipeline_mode<synchronous>, transform_indices = @transform_4, window_bounds = array<i64: 3, 128, 128>}, {pipeline_mode = #tpu.pipeline_mode<synchronous>, transform_indices = @transform_5, window_bounds = array<i64: 3, 1, 512>}, {pipeline_mode = #tpu.pipeline_mode<synchronous>, transform_indices = @transform_6, window_bounds = array<i64: 128, 128>}, {pipeline_mode = #tpu.pipeline_mode<synchronous>, transform_indices = @transform_7, window_bounds = array<i64: 1, 128>}, {transform_indices = @transform_8, window_bounds = array<i64: 8, 128>}]} {
    %c0 = arith.constant 0 : index
    %c0_0 = arith.constant 0 : index
    %0 = vector.load %arg1[%c0, %c0_0] : memref<8x8xf32, #tpu.memory_space<vmem>>, vector<8x8xf32>
    %c0_1 = arith.constant 0 : index
    %c128 = arith.constant 128 : index
    %1 = vector.load %arg10[%c0_1, %c128] : memref<8x136xf32, #tpu.memory_space<vmem>>, vector<8x8xf32>
    tpu.vector_store %arg10[%c0_1, %c128], %0 {strides = array<i32>} : memref<8x136xf32, #tpu.memory_space<vmem>>, vector<8x8xf32>,
    %2 = arith.truncf %0 : vector<8x8xf32> to vector<8x8xbf16>
    %c0_2 = arith.constant 0 : index
    %c0_3 = arith.constant 0 : index
    %3 = vector.load %arg2[%c0_2, %c0_3] : memref<8x128xbf16, #tpu.memory_space<vmem>>, vector<8x128xbf16>
    %cst = arith.constant dense<0.000000e+00> : vector<8x128xf32>
    %4 = tpu.matmul %2, %3, %cst {dimension_numbers = #tpu.dot_dimension_numbers<[1], [0], [0], [1], [0, 0, 1, 1], [], []>} : vector<8x8xbf16>, vector<8x128xbf16>, vector<8x128xf32> -> vector<8x128xf32>
    %c0_4 = arith.constant 0 : index
    %c0_5 = arith.constant 0 : index
    %5 = vector.load %arg3[%c0_4, %c0_5] : memref<1x128xf32, #tpu.memory_space<vmem>>, vector<1x128xf32>
    %6 = vector.broadcast %5 : vector<1x128xf32> to vector<8x128xf32>
    %7 = arith.addf %4, %6 : vector<8x128xf32>
    %cst_6 = arith.constant 0.000000e+00 : f32
    %8 = vector.broadcast %cst_6 : f32 to vector<8x128xf32>
    %9 = arith.maximumf %7, %8 : vector<8x128xf32>
    %c0_7 = arith.constant 0 : index
    %c0_8 = arith.constant 0 : index
    %10 = vector.load %arg10[%c0_7, %c0_8] : memref<8x136xf32, #tpu.memory_space<vmem>>, vector<8x128xf32>
    tpu.vector_store %arg10[%c0_7, %c0_8], %9 {strides = array<i32>} : memref<8x136xf32, #tpu.memory_space<vmem>>, vector<8x128xf32>,
    %c0_i32 = arith.constant 0 : i32
    %c0_9 = arith.constant 0 : index
    %c0_10 = arith.constant 0 : index
    %11 = vector.load %arg10[%c0_9, %c0_10] : memref<8x136xf32, #tpu.memory_space<vmem>>, vector<8x136xf32>
    %12 = arith.truncf %11 : vector<8x136xf32> to vector<8x136xbf16>
    %13 = arith.index_cast %c0_i32 : i32 to index
    %c0_11 = arith.constant 0 : index
    %c0_12 = arith.constant 0 : index
    %14 = vector.load %arg4[%13, %c0_11, %c0_12] : memref<3x136x512xbf16, #tpu.memory_space<vmem>>, vector<1x136x512xbf16>
    %15 = vector.shape_cast %14 : vector<1x136x512xbf16> to vector<136x512xbf16>
    %cst_13 = arith.constant dense<0.000000e+00> : vector<8x512xf32>
    %16 = tpu.matmul %12, %15, %cst_13 {dimension_numbers = #tpu.dot_dimension_numbers<[1], [0], [0], [1], [0, 0, 1, 1], [], []>} : vector<8x136xbf16>, vector<136x512xbf16>, vector<8x512xf32> -> vector<8x512xf32>
    %17 = arith.index_cast %c0_i32 : i32 to index
    %c0_14 = arith.constant 0 : index
    %c0_15 = arith.constant 0 : index
    %18 = vector.load %arg6[%17, %c0_14, %c0_15] : memref<3x1x512xf32, #tpu.memory_space<vmem>>, vector<1x1x512xf32>
    %19 = vector.shape_cast %18 : vector<1x1x512xf32> to vector<1x512xf32>
    %20 = vector.broadcast %19 : vector<1x512xf32> to vector<8x512xf32>
    %21 = arith.addf %16, %20 : vector<8x512xf32>
    %c0_16 = arith.constant 0 : index
    %c0_17 = arith.constant 0 : index
    %22 = vector.load %arg10[%c0_16, %c0_17] : memref<8x136xf32, #tpu.memory_space<vmem>>, vector<8x128xf32>
    %23 = vector.extract_strided_slice %21 {offsets = [0, 0], sizes = [8, 128], strides = [1, 1]} : vector<8x512xf32> to vector<8x128xf32>
    %24 = math.tanh %23 : vector<8x128xf32>
    %25 = vector.extract_strided_slice %21 {offsets = [0, 128], sizes = [8, 128], strides = [1, 1]} : vector<8x512xf32> to vector<8x128xf32>
    %26 = math.tanh %25 : vector<8x128xf32>
    %27 = vector.extract_strided_slice %21 {offsets = [0, 256], sizes = [8, 128], strides = [1, 1]} : vector<8x512xf32> to vector<8x128xf32>
    %28 = math.tanh %27 : vector<8x128xf32>
    %29 = vector.extract_strided_slice %21 {offsets = [0, 384], sizes = [8, 128], strides = [1, 1]} : vector<8x512xf32> to vector<8x128xf32>
    %30 = arith.mulf %22, %28 : vector<8x128xf32>
    %31 = arith.truncf %30 : vector<8x128xf32> to vector<8x128xbf16>
    %32 = arith.index_cast %c0_i32 : i32 to index
    %c0_18 = arith.constant 0 : index
    %c0_19 = arith.constant 0 : index
    %33 = vector.load %arg5[%32, %c0_18, %c0_19] : memref<3x128x128xbf16, #tpu.memory_space<vmem>>, vector<1x128x128xbf16>
    %34 = vector.shape_cast %33 : vector<1x128x128xbf16> to vector<128x128xbf16>
    %cst_20 = arith.constant dense<0.000000e+00> : vector<8x128xf32>
    %35 = tpu.matmul %31, %34, %cst_20 {dimension_numbers = #tpu.dot_dimension_numbers<[1], [0], [0], [1], [0, 0, 1, 1], [], []>} : vector<8x128xbf16>, vector<128x128xbf16>, vector<8x128xf32> -> vector<8x128xf32>
    %36 = arith.addf %29, %35 : vector<8x128xf32>
    %37 = math.tanh %36 : vector<8x128xf32>
    %cst_21 = arith.constant 1.000000e+00 : f32
    %38 = vector.broadcast %cst_21 : f32 to vector<8x128xf32>
    %39 = arith.subf %38, %26 : vector<8x128xf32>
    %40 = arith.mulf %39, %37 : vector<8x128xf32>
    %41 = arith.mulf %24, %22 : vector<8x128xf32>
    %42 = arith.addf %40, %41 : vector<8x128xf32>
    %c0_22 = arith.constant 0 : index
    %c0_23 = arith.constant 0 : index
    %43 = vector.load %arg10[%c0_22, %c0_23] : memref<8x136xf32, #tpu.memory_space<vmem>>, vector<8x128xf32>
    tpu.vector_store %arg10[%c0_22, %c0_23], %42 {strides = array<i32>} : memref<8x136xf32, #tpu.memory_space<vmem>>, vector<8x128xf32>,
    %c1_i32 = arith.constant 1 : i32
    %c0_24 = arith.constant 0 : index
    %c0_25 = arith.constant 0 : index
    %44 = vector.load %arg10[%c0_24, %c0_25] : memref<8x136xf32, #tpu.memory_space<vmem>>, vector<8x136xf32>
    %45 = arith.truncf %44 : vector<8x136xf32> to vector<8x136xbf16>
    %46 = arith.index_cast %c1_i32 : i32 to index
    %c0_26 = arith.constant 0 : index
    %c0_27 = arith.constant 0 : index
    %47 = vector.load %arg4[%46, %c0_26, %c0_27] : memref<3x136x512xbf16, #tpu.memory_space<vmem>>, vector<1x136x512xbf16>
    %48 = vector.shape_cast %47 : vector<1x136x512xbf16> to vector<136x512xbf16>
    %cst_28 = arith.constant dense<0.000000e+00> : vector<8x512xf32>
    %49 = tpu.matmul %45, %48, %cst_28 {dimension_numbers = #tpu.dot_dimension_numbers<[1], [0], [0], [1], [0, 0, 1, 1], [], []>} : vector<8x136xbf16>, vector<136x512xbf16>, vector<8x512xf32> -> vector<8x512xf32>
    %50 = arith.index_cast %c1_i32 : i32 to index
    %c0_29 = arith.constant 0 : index
    %c0_30 = arith.constant 0 : index
    %51 = vector.load %arg6[%50, %c0_29, %c0_30] : memref<3x1x512xf32, #tpu.memory_space<vmem>>, vector<1x1x512xf32>
    %52 = vector.shape_cast %51 : vector<1x1x512xf32> to vector<1x512xf32>
    %53 = vector.broadcast %52 : vector<1x512xf32> to vector<8x512xf32>
    %54 = arith.addf %49, %53 : vector<8x512xf32>
    %c0_31 = arith.constant 0 : index
    %c0_32 = arith.constant 0 : index
    %55 = vector.load %arg10[%c0_31, %c0_32] : memref<8x136xf32, #tpu.memory_space<vmem>>, vector<8x128xf32>
    %56 = vector.extract_strided_slice %54 {offsets = [0, 0], sizes = [8, 128], strides = [1, 1]} : vector<8x512xf32> to vector<8x128xf32>
    %57 = math.tanh %56 : vector<8x128xf32>
    %58 = vector.extract_strided_slice %54 {offsets = [0, 128], sizes = [8, 128], strides = [1, 1]} : vector<8x512xf32> to vector<8x128xf32>
    %59 = math.tanh %58 : vector<8x128xf32>
    %60 = vector.extract_strided_slice %54 {offsets = [0, 256], sizes = [8, 128], strides = [1, 1]} : vector<8x512xf32> to vector<8x128xf32>
    %61 = math.tanh %60 : vector<8x128xf32>
    %62 = vector.extract_strided_slice %54 {offsets = [0, 384], sizes = [8, 128], strides = [1, 1]} : vector<8x512xf32> to vector<8x128xf32>
    %63 = arith.mulf %55, %61 : vector<8x128xf32>
    %64 = arith.truncf %63 : vector<8x128xf32> to vector<8x128xbf16>
    %65 = arith.index_cast %c1_i32 : i32 to index
    %c0_33 = arith.constant 0 : index
    %c0_34 = arith.constant 0 : index
    %66 = vector.load %arg5[%65, %c0_33, %c0_34] : memref<3x128x128xbf16, #tpu.memory_space<vmem>>, vector<1x128x128xbf16>
    %67 = vector.shape_cast %66 : vector<1x128x128xbf16> to vector<128x128xbf16>
    %cst_35 = arith.constant dense<0.000000e+00> : vector<8x128xf32>
    %68 = tpu.matmul %64, %67, %cst_35 {dimension_numbers = #tpu.dot_dimension_numbers<[1], [0], [0], [1], [0, 0, 1, 1], [], []>} : vector<8x128xbf16>, vector<128x128xbf16>, vector<8x128xf32> -> vector<8x128xf32>
    %69 = arith.addf %62, %68 : vector<8x128xf32>
    %70 = math.tanh %69 : vector<8x128xf32>
    %cst_36 = arith.constant 1.000000e+00 : f32
    %71 = vector.broadcast %cst_36 : f32 to vector<8x128xf32>
    %72 = arith.subf %71, %59 : vector<8x128xf32>
    %73 = arith.mulf %72, %70 : vector<8x128xf32>
    %74 = arith.mulf %57, %55 : vector<8x128xf32>
    %75 = arith.addf %73, %74 : vector<8x128xf32>
    %c0_37 = arith.constant 0 : index
    %c0_38 = arith.constant 0 : index
    %76 = vector.load %arg10[%c0_37, %c0_38] : memref<8x136xf32, #tpu.memory_space<vmem>>, vector<8x128xf32>
    tpu.vector_store %arg10[%c0_37, %c0_38], %75 {strides = array<i32>} : memref<8x136xf32, #tpu.memory_space<vmem>>, vector<8x128xf32>,
    %c2_i32 = arith.constant 2 : i32
    %c0_39 = arith.constant 0 : index
    %c0_40 = arith.constant 0 : index
    %77 = vector.load %arg10[%c0_39, %c0_40] : memref<8x136xf32, #tpu.memory_space<vmem>>, vector<8x136xf32>
    %78 = arith.truncf %77 : vector<8x136xf32> to vector<8x136xbf16>
    %79 = arith.index_cast %c2_i32 : i32 to index
    %c0_41 = arith.constant 0 : index
    %c0_42 = arith.constant 0 : index
    %80 = vector.load %arg4[%79, %c0_41, %c0_42] : memref<3x136x512xbf16, #tpu.memory_space<vmem>>, vector<1x136x512xbf16>
    %81 = vector.shape_cast %80 : vector<1x136x512xbf16> to vector<136x512xbf16>
    %cst_43 = arith.constant dense<0.000000e+00> : vector<8x512xf32>
    %82 = tpu.matmul %78, %81, %cst_43 {dimension_numbers = #tpu.dot_dimension_numbers<[1], [0], [0], [1], [0, 0, 1, 1], [], []>} : vector<8x136xbf16>, vector<136x512xbf16>, vector<8x512xf32> -> vector<8x512xf32>
    %83 = arith.index_cast %c2_i32 : i32 to index
    %c0_44 = arith.constant 0 : index
    %c0_45 = arith.constant 0 : index
    %84 = vector.load %arg6[%83, %c0_44, %c0_45] : memref<3x1x512xf32, #tpu.memory_space<vmem>>, vector<1x1x512xf32>
    %85 = vector.shape_cast %84 : vector<1x1x512xf32> to vector<1x512xf32>
    %86 = vector.broadcast %85 : vector<1x512xf32> to vector<8x512xf32>
    %87 = arith.addf %82, %86 : vector<8x512xf32>
    %c0_46 = arith.constant 0 : index
    %c0_47 = arith.constant 0 : index
    %88 = vector.load %arg10[%c0_46, %c0_47] : memref<8x136xf32, #tpu.memory_space<vmem>>, vector<8x128xf32>
    %89 = vector.extract_strided_slice %87 {offsets = [0, 0], sizes = [8, 128], strides = [1, 1]} : vector<8x512xf32> to vector<8x128xf32>
    %90 = math.tanh %89 : vector<8x128xf32>
    %91 = vector.extract_strided_slice %87 {offsets = [0, 128], sizes = [8, 128], strides = [1, 1]} : vector<8x512xf32> to vector<8x128xf32>
    %92 = math.tanh %91 : vector<8x128xf32>
    %93 = vector.extract_strided_slice %87 {offsets = [0, 256], sizes = [8, 128], strides = [1, 1]} : vector<8x512xf32> to vector<8x128xf32>
    %94 = math.tanh %93 : vector<8x128xf32>
    %95 = vector.extract_strided_slice %87 {offsets = [0, 384], sizes = [8, 128], strides = [1, 1]} : vector<8x512xf32> to vector<8x128xf32>
    %96 = arith.mulf %88, %94 : vector<8x128xf32>
    %97 = arith.truncf %96 : vector<8x128xf32> to vector<8x128xbf16>
    %98 = arith.index_cast %c2_i32 : i32 to index
    %c0_48 = arith.constant 0 : index
    %c0_49 = arith.constant 0 : index
    %99 = vector.load %arg5[%98, %c0_48, %c0_49] : memref<3x128x128xbf16, #tpu.memory_space<vmem>>, vector<1x128x128xbf16>
    %100 = vector.shape_cast %99 : vector<1x128x128xbf16> to vector<128x128xbf16>
    %cst_50 = arith.constant dense<0.000000e+00> : vector<8x128xf32>
    %101 = tpu.matmul %97, %100, %cst_50 {dimension_numbers = #tpu.dot_dimension_numbers<[1], [0], [0], [1], [0, 0, 1, 1], [], []>} : vector<8x128xbf16>, vector<128x128xbf16>, vector<8x128xf32> -> vector<8x128xf32>
    %102 = arith.addf %95, %101 : vector<8x128xf32>
    %103 = math.tanh %102 : vector<8x128xf32>
    %cst_51 = arith.constant 1.000000e+00 : f32
    %104 = vector.broadcast %cst_51 : f32 to vector<8x128xf32>
    %105 = arith.subf %104, %92 : vector<8x128xf32>
    %106 = arith.mulf %105, %103 : vector<8x128xf32>
    %107 = arith.mulf %90, %88 : vector<8x128xf32>
    %108 = arith.addf %106, %107 : vector<8x128xf32>
    %c0_52 = arith.constant 0 : index
    %c0_53 = arith.constant 0 : index
    %109 = vector.load %arg10[%c0_52, %c0_53] : memref<8x136xf32, #tpu.memory_space<vmem>>, vector<8x128xf32>
    tpu.vector_store %arg10[%c0_52, %c0_53], %108 {strides = array<i32>} : memref<8x136xf32, #tpu.memory_space<vmem>>, vector<8x128xf32>,
    %c3_i32 = arith.constant 3 : i32
    %c0_54 = arith.constant 0 : index
    %c0_55 = arith.constant 0 : index
    %110 = vector.load %arg10[%c0_54, %c0_55] : memref<8x136xf32, #tpu.memory_space<vmem>>, vector<8x128xf32>
    %111 = arith.truncf %110 : vector<8x128xf32> to vector<8x128xbf16>
    %c0_56 = arith.constant 0 : index
    %c0_57 = arith.constant 0 : index
    %112 = vector.load %arg7[%c0_56, %c0_57] : memref<128x128xbf16, #tpu.memory_space<vmem>>, vector<128x128xbf16>
    %cst_58 = arith.constant dense<0.000000e+00> : vector<8x128xf32>
    %113 = tpu.matmul %111, %112, %cst_58 {dimension_numbers = #tpu.dot_dimension_numbers<[1], [0], [0], [1], [0, 0, 1, 1], [], []>} : vector<8x128xbf16>, vector<128x128xbf16>, vector<8x128xf32> -> vector<8x128xf32>
    %c0_59 = arith.constant 0 : index
    %c0_60 = arith.constant 0 : index
    %114 = vector.load %arg8[%c0_59, %c0_60] : memref<1x128xf32, #tpu.memory_space<vmem>>, vector<1x128xf32>
    %115 = vector.broadcast %114 : vector<1x128xf32> to vector<8x128xf32>
    %116 = arith.addf %113, %115 : vector<8x128xf32>
    %c0_61 = arith.constant 0 : index
    %c0_62 = arith.constant 0 : index
    %117 = vector.load %arg9[%c0_61, %c0_62] : memref<8x128xf32, #tpu.memory_space<vmem>>, vector<8x128xf32>
    tpu.vector_store %arg9[%c0_61, %c0_62], %116 {strides = array<i32>} : memref<8x128xf32, #tpu.memory_space<vmem>>, vector<8x128xf32>,
    return
  }
  func.func @transform_0(%arg0: i32) -> (i32, i32) {
    %c0_i32 = arith.constant 0 : i32
    %c0_i32_0 = arith.constant 0 : i32
    return %arg0, %c0_i32 : i32, i32
  }
  func.func @transform_1(%arg0: i32) -> (i32, i32) {
    %c0_i32 = arith.constant 0 : i32
    %c0_i32_0 = arith.constant 0 : i32
    %c0_i32_1 = arith.constant 0 : i32
    return %c0_i32, %c0_i32_0 : i32, i32
  }
  func.func @transform_2(%arg0: i32) -> (i32, i32) {
    %c0_i32 = arith.constant 0 : i32
    %c0_i32_0 = arith.constant 0 : i32
    %c0_i32_1 = arith.constant 0 : i32
    return %c0_i32, %c0_i32_0 : i32, i32
  }
  func.func @transform_3(%arg0: i32) -> (i32, i32, i32) {
    %c0_i32 = arith.constant 0 : i32
    %c0_i32_0 = arith.constant 0 : i32
    %c0_i32_1 = arith.constant 0 : i32
    %c0_i32_2 = arith.constant 0 : i32
    return %c0_i32, %c0_i32_0, %c0_i32_1 : i32, i32, i32
  }
  func.func @transform_4(%arg0: i32) -> (i32, i32, i32) {
    %c0_i32 = arith.constant 0 : i32
    %c0_i32_0 = arith.constant 0 : i32
    %c0_i32_1 = arith.constant 0 : i32
    %c0_i32_2 = arith.constant 0 : i32
    return %c0_i32, %c0_i32_0, %c0_i32_1 : i32, i32, i32
  }
  func.func @transform_5(%arg0: i32) -> (i32, i32, i32) {
    %c0_i32 = arith.constant 0 : i32
    %c0_i32_0 = arith.constant 0 : i32
    %c0_i32_1 = arith.constant 0 : i32
    %c0_i32_2 = arith.constant 0 : i32
    return %c0_i32, %c0_i32_0, %c0_i32_1 : i32, i32, i32
  }
  func.func @transform_6(%arg0: i32) -> (i32, i32) {
    %c0_i32 = arith.constant 0 : i32
    %c0_i32_0 = arith.constant 0 : i32
    %c0_i32_1 = arith.constant 0 : i32
    return %c0_i32, %c0_i32_0 : i32, i32
  }
  func.func @transform_7(%arg0: i32) -> (i32, i32) {
    %c0_i32 = arith.constant 0 : i32
    %c0_i32_0 = arith.constant 0 : i32
    %c0_i32_1 = arith.constant 0 : i32
    return %c0_i32, %c0_i32_0 : i32, i32
  }
  func.func @transform_8(%arg0: i32) -> (i32, i32) {
    %c0_i32 = arith.constant 0 : i32
    %c0_i32_0 = arith.constant 0 : i32
    return %arg0, %c0_i32 : i32, i32
  }
}

</mosaic_0001>

<bundles_post_ra>
// kernel: _lambda_.1
= control target key start
LH: loop header
LB: loop body
LE: loop exit
PB: predicated region body
PF: predicated region fallthrough
CT: control target
= control target key end

     0   :  { %13 = vsyncpa [#allocation4], 0  ;;  %s2389_s0 = inlined_call_operand.vmem [shape: f32[8,8], index: 0, kind: input, shape index: {}]   ;;  %s2390_s1 = inlined_call_operand.vmem [shape: bf16[8,128], index: 1, kind: input, shape index: {}]   ;;  %s2391_s2 = inlined_call_operand.vmem [shape: f32[1,128], index: 2, kind: input, shape index: {}]   ;;  %s2392_s3 = inlined_call_operand.hbm [shape: bf16[3,136,512], index: 3, kind: input, shape index: {}]   ;;  %s2393_s4 = inlined_call_operand.hbm [shape: bf16[3,128,128], index: 4, kind: input, shape index: {}]   ;;  %s2394_s5 = inlined_call_operand.vmem [shape: f32[3,1,512], index: 5, kind: input, shape index: {}]   ;;  %s2395_s6 = inlined_call_operand.hbm [shape: bf16[128,128], index: 6, kind: input, shape index: {}]   ;;  %s2396_s7 = inlined_call_operand.vmem [shape: f32[1,128], index: 7, kind: input, shape index: {}]   ;;  %s2397_s8 = inlined_call_operand.vmem [shape: f32[8,128], index: 8, kind: output, shape index: {}]  }
   0x1   :  { %14 = vsyncpa [#allocation6], 0  ;;  %s2156_s27 = smov [#allocation5]  }
   0x2   :  { %s38_s28 = sshll.u32 %s2156_s27, 4  ;;  %s39_s28 = int_to_ptr.vmem [resolvable:$true] %s38_s28 }
   0x3   :  { %s2100_s29 = scalar_lea.vmem %s39_s28, 3072  ;;  %p2105_p1 = scmp.lt.s32.totalorder %s39_s28, %s39_s28 }
   0x4   :  { %p2101_p0 = scmp.ne.s32.totalorder %s39_s28, %s2100_s29  ;;  %p2106_p2 = scmp.lt.s32.totalorder %s2100_s29, %s2100_s29 }
   0x6   :  { %p2107_p3 = por %p2106_p2, %p2105_p1 }
   0x8   :  { %p2108_p4 = pnand %p2107_p3, %p2101_p0 }
   0xa   :  { %2111 = shalt.err (!%p2108_p4)
}
   0xb   :  { %s2157_s30 = smov 64   ;;  %s2158_s9 = smov 4  }
   0xc   :  { %44 = dma.hbm_to_vmem [thread:$0]  %s2393_s4, 3072, %s39_s28, [#allocation6], %s2157_s30, %s2157_s30, %s2158_s9  }
   0xd   :  { %s2159_s12 = smov [#allocation3]  }
   0xe   :  { %s26_s13 = sshll.u32 %s2159_s12, 4  ;;  %s27_s13 = int_to_ptr.vmem [resolvable:$true] %s26_s13 }
   0xf   :  { %s2120_s14 = scalar_lea.vmem %s27_s13, 13056  ;;  %p2125_p6 = scmp.lt.s32.totalorder %s27_s13, %s27_s13 }
  0x10   :  { %p2121_p5 = scmp.ne.s32.totalorder %s27_s13, %s2120_s14  ;;  %p2126_p7 = scmp.lt.s32.totalorder %s2120_s14, %s2120_s14 }
  0x12   :  { %p2127_p8 = por %p2126_p7, %p2125_p6 }
  0x14   :  { %p2128_p9 = pnand %p2127_p8, %p2121_p5 }
  0x16   :  { %2131 = shalt.err (!%p2128_p9)
}
  0x17   :  { %s2160_s15 = smov 256   ;;  %s2161_s16 = smov 16  }
  0x18   :  { %32 = dma.hbm_to_vmem [thread:$0]  %s2392_s3, 13056, %s27_s13, [#allocation4], %s2160_s15, %s2160_s15, %s2161_s16  }
  0x19   :  { %s2162_s19 = smov [#allocation7]  }
  0x1a   :  { %s52_s20 = sshll.u32 %s2162_s19, 4  ;;  %s53_s20 = int_to_ptr.vmem [resolvable:$true] %s52_s20 }
  0x1b   :  { %s2140_s4 = scalar_lea.vmem %s53_s20, 1024  ;;  %p2145_p11 = scmp.lt.s32.totalorder %s53_s20, %s53_s20 }
  0x1c   :  { %p2141_p10 = scmp.ne.s32.totalorder %s53_s20, %s2140_s4  ;;  %p2146_p12 = scmp.lt.s32.totalorder %s2140_s4, %s2140_s4 }
  0x1e   :  { %p2147_p13 = por %p2146_p12, %p2145_p11 }
  0x20   :  { %p2148_p0 = pnand %p2147_p13, %p2141_p10 }
  0x22   :  { %2151 = shalt.err (!%p2148_p0)
}
  0x23   :  { %58 = dma.hbm_to_vmem [thread:$0]  %s2395_s6, 1024, %s53_s20, [#allocation6], %s2157_s30, %s2157_s30, %s2158_s9  }
  0x24   :  { %2152 = dma.done.wait [#allocation4], 13056  }
  0x25   :  { %2153 = vsyncadd [#allocation4], 4294954240 }
  0x26   :  { %2154 = dma.done.wait [#allocation6], 4096  }
  0x27   :  { %2155 = vsyncadd [#allocation6], 4294963200  ;;  %v2163_v0 = vmov 0.0   ;;  %vm2164_vm0 = vmmov 0   ;;  %vm86_vm1 = vcmask 1043456   ;;  %v71_v2 = vld [vmem:[%s2389_s0] sm:$0xff] }
  0x28   :  { %1785 = vmatprep.subr.bf16.mxu0 %v2163_v0  ;;  %1787 = vmatprep.mubr.msk.bf16.mxu0 %vm2164_vm0, %v2163_v0  ;;  %v75_v1 = vld [vmem:[%s2390_s1] sm:$0xf]  ;;  %vm72_vm2 = vcmask 64512   ;;  %v74_v4 = vpack.c.bf16 %v71_v2, %v71_v2  ;;  %v1880_v5 = vld [vmem:[#allocation3 + $0xe4] ss:$16 sps:$4 sm:$0xff]   ;;  %v169_v38 = vld [vmem:[#allocation3 + $0x108] sm:$0xff] }
  0x29   :  { %v88_v3 = vsel %vm86_vm1, %v75_v1, 0  ;;  %73 = vst.msk [vmem:[#allocation2 + $0x8] sm:$0xff] %vm72_vm2, %v71_v2  ;;  %v1882_v6 = vld [vmem:[#allocation3 + $0xe8] ss:$16 sps:$4 sm:$0xff]   ;;  %v1884_v7 = vld [vmem:[#allocation3 + $0xec] ss:$16 sps:$4 sm:$0xff]   ;;  %377 = vmatprep.subr.bf16.mxu1 %v1880_v5  ;;  %v1627_v40 = vcombine.high %v169_v38, %v169_v38  ;;  %v1626_v42 = vcombine.low %v169_v38, %v169_v38  ;;  %v172_v5 = vlaneseq }
  0x2a   :  { %1786 = vmatpush3.bf16.msra.mxu0 %v88_v3  ;;  %v1885_v8 = vld [vmem:[#allocation3 + $0xe0] ss:$16 sps:$4 sm:$0xff]   ;;  %v1886_v9 = vld [vmem:[#allocation3 + $0xc4] ss:$16 sps:$4 sm:$0xff]   ;;  %v1888_v10 = vld [vmem:[#allocation3 + $0xc8] ss:$16 sps:$4 sm:$0xff]  }
  0x2b   :  { %418 = vmatprep.subr.bf16.mxu0 %v1884_v7  ;;  %378 = vmatpush1.bf16.msra.mxu1 %v1885_v8  ;;  %v1890_v11 = vld [vmem:[#allocation3 + $0xcc] ss:$16 sps:$4 sm:$0xff]   ;;  %v1891_v12 = vld [vmem:[#allocation3 + $0xc0] ss:$16 sps:$4 sm:$0xff]   ;;  %v1892_v13 = vld [vmem:[#allocation3 + $0xa4] ss:$16 sps:$4 sm:$0xff]  }
  0x2c   :  { %379 = vmatprep.subr.bf16.mxu1 %v1886_v9  ;;  %v1896_v14 = vld [vmem:[#allocation3 + $0xac] ss:$16 sps:$4 sm:$0xff]   ;;  %v1897_v15 = vld [vmem:[#allocation3 + $0xa0] ss:$16 sps:$4 sm:$0xff]   ;;  %v1894_v16 = vld [vmem:[#allocation3 + $0xa8] ss:$16 sps:$4 sm:$0xff]  }
  0x2d   :  { %1788 = vmatmul.mubr.msk.bf16.vlgmr.msra.gmra.mxu0 %vm72_vm2, %v74_v4  ;;  %v1898_v17 = vld [vmem:[#allocation3 + $0x84] ss:$16 sps:$4 sm:$0xff]   ;;  %v1902_v18 = vld [vmem:[#allocation3 + $0x8c] ss:$16 sps:$4 sm:$0xff]   ;;  %v1900_v19 = vld [vmem:[#allocation3 + $0x88] ss:$16 sps:$4 sm:$0xff]  }
  0x2e   :  { %419 = vmatpush1.bf16.msra.mxu0 %v1882_v6  ;;  %v1903_v20 = vld [vmem:[#allocation3 + $0x80] ss:$16 sps:$4 sm:$0xff]   ;;  %v1904_v21 = vld [vmem:[#allocation3 + $0x64] ss:$16 sps:$4 sm:$0xff]   ;;  %v1908_v22 = vld [vmem:[#allocation3 + $0x6c] ss:$16 sps:$4 sm:$0xff]  }
  0x2f   :  { %420 = vmatprep.subr.bf16.mxu0 %v1890_v11  ;;  %380 = vmatpush1.bf16.msra.mxu1 %v1891_v12  ;;  %v1906_v23 = vld [vmem:[#allocation3 + $0x68] ss:$16 sps:$4 sm:$0xff]   ;;  %v1909_v24 = vld [vmem:[#allocation3 + $0x60] ss:$16 sps:$4 sm:$0xff]   ;;  %v1910_v25 = vld [vmem:[#allocation3 + $0x44] ss:$16 sps:$4 sm:$0xff]  }
  0x30   :  { %381 = vmatprep.subr.bf16.mxu1 %v1892_v13  ;;  %v1914_v26 = vld [vmem:[#allocation3 + $0x4c] ss:$16 sps:$4 sm:$0xff]   ;;  %v1912_v27 = vld [vmem:[#allocation3 + $0x48] ss:$16 sps:$4 sm:$0xff]   ;;  %v1915_v28 = vld [vmem:[#allocation3 + $0x40] ss:$16 sps:$4 sm:$0xff]  }
  0x31   :  { %v1916_v29 = vld [vmem:[#allocation3 + $0x24] ss:$16 sps:$4 sm:$0xff]   ;;  %v1920_v30 = vld [vmem:[#allocation3 + $0x2c] ss:$16 sps:$4 sm:$0xff]   ;;  %v1918_v31 = vld [vmem:[#allocation3 + $0x28] ss:$16 sps:$4 sm:$0xff]  }
  0x32   :  { %421 = vmatpush1.bf16.msra.mxu0 %v1888_v10  ;;  %v1921_v32 = vld [vmem:[#allocation3 + $0x20] ss:$16 sps:$4 sm:$0xff]   ;;  %v1922_v33 = vld [vmem:[#allocation3 + $0x4] ss:$16 sps:$4 sm:$0xff]   ;;  %v1926_v34 = vld [vmem:[#allocation3 + $0xc] ss:$16 sps:$4 sm:$0xff]  }
  0x33   :  { %422 = vmatprep.subr.bf16.mxu0 %v1896_v14  ;;  %382 = vmatpush1.bf16.msra.mxu1 %v1897_v15  ;;  %v1924_v35 = vld [vmem:[#allocation3 + $0x8] ss:$16 sps:$4 sm:$0xff]   ;;  %v1927_v36 = vld [vmem:[#allocation3] ss:$16 sps:$4 sm:$0xff]   ;;  %v372_v44 = vsel %vm86_vm1, %v1626_v42, 0  ;;  %v2260_v6 = vshrl.u32 %v172_v5, 7 }
  0x34   :  { %383 = vmatprep.subr.bf16.mxu1 %v1898_v17  ;;  %v168_v37 = vld [vmem:[#allocation3 + $0x100] sm:$0xff]  ;;  %v133_v45 = vld [vmem:[#allocation2 + $0x8] sm:$0xff]  ;;  %v1590_v47 = vld [vmem:[%s2391_s2] ss:$0 sm:$0xff] }
  0x35   :  { %v1625_v39 = vcombine.high %v168_v37, %v168_v37  ;;  %v1624_v41 = vcombine.low %v168_v37, %v168_v37  ;;  %v2235_v46 = vpack.c.bf16 %v133_v45, %v133_v45  ;;  %v1932_v53 = vld [vmem:[#allocation5 + $0x38] sm:$0xff]   ;;  %v1933_v56 = vld [vmem:[#allocation5 + $0x30] sm:$0xff]   ;;  %v1934_v57 = vld [vmem:[#allocation5 + $0x28] sm:$0xff]   ;;  %v2263_v7 = vsub.s32 2, %v2260_v6 }
  0x36   :  { %423 = vmatpush1.bf16.msra.mxu0 %v1894_v16  ;;  %v1935_v58 = vld [vmem:[#allocation5 + $0x20] sm:$0xff]   ;;  %v1936_v59 = vld [vmem:[#allocation5 + $0x18] sm:$0xff]   ;;  %v1937_v60 = vld [vmem:[#allocation5 + $0x10] sm:$0xff]  }
  0x37   :  { %424 = vmatprep.subr.bf16.mxu0 %v1902_v18  ;;  %384 = vmatpush1.bf16.msra.mxu1 %v1903_v20  ;;  %v366_v43 = vsel %vm86_vm1, %v1624_v41, 0  ;;  %v1938_v61 = vld [vmem:[#allocation5 + $0x8] sm:$0xff]   ;;  %v1939_v62 = vld [vmem:[#allocation5] sm:$0xff]  }
  0x38   :  { %385 = vmatprep.subr.bf16.mxu1 %v1904_v21  ;;  %1629 = vmatprep.mubr.msk.bf16.mxu1 %vm72_vm2, %v2235_v46  ;;  %v1940_v63 = vld [vmem:[#allocation3 + $0x1f0] ss:$16 sps:$4 sm:$0xff]   ;;  %v1942_v1 = vld [vmem:[#allocation3 + $0x1f4] ss:$16 sps:$4 sm:$0xff]   ;;  %v1945_v2 = vld [vmem:[#allocation3 + $0x1fc] ss:$16 sps:$4 sm:$0xff]  }
  0x39   :  { %1631 = vmatprep.mubr.msk.bf16.mxu0 %vm72_vm2, %v2235_v46  ;;  %v1948_v3 = vld [vmem:[#allocation3 + $0x1d4] ss:$16 sps:$4 sm:$0xff]   ;;  %v1946_v4 = vld [vmem:[#allocation3 + $0x1d0] ss:$16 sps:$4 sm:$0xff]   ;;  %v1943_v21 = vld [vmem:[#allocation3 + $0x1f8] ss:$16 sps:$4 sm:$0xff]  }
  0x3a   :  { %425 = vmatpush1.bf16.msra.mxu0 %v1900_v19  ;;  %v2268_v8 = vld [vmem:[%s2394_s5] sm:$0xf]  ;;  %v1972_v37 = vld [vmem:[#allocation3 + $0x154] ss:$16 sps:$4 sm:$0xff]   ;;  %v1975_v38 = vld [vmem:[#allocation3 + $0x15c] ss:$16 sps:$4 sm:$0xff]  }
  0x3b   :  { %426 = vmatprep.subr.bf16.mxu0 %v1908_v22  ;;  %386 = vmatpush1.bf16.msra.mxu1 %v1909_v24  ;;  %v183_v9 = vrot.slane %v2268_v8, %v2263_v7  ;;  %v1949_v24 = vld [vmem:[#allocation3 + $0x1d8] ss:$16 sps:$4 sm:$0xff]   ;;  %v1978_v41 = vld [vmem:[#allocation3 + $0x134] ss:$16 sps:$4 sm:$0xff]   ;;  %v1981_v42 = vld [vmem:[#allocation3 + $0x13c] ss:$16 sps:$4 sm:$0xff]  }
  0x3c   :  { %387 = vmatprep.subr.bf16.mxu1 %v1910_v25  ;;  %v1954_v25 = vld [vmem:[#allocation3 + $0x1b4] ss:$16 sps:$4 sm:$0xff]  }
  0x3d   :  { %v1984_v45 = vld [vmem:[#allocation3 + $0x114] ss:$16 sps:$4 sm:$0xff]  }
  0x3e   :  { %427 = vmatpush1.bf16.msra.mxu0 %v1906_v23  ;;  %v1951_v23 = vld [vmem:[#allocation3 + $0x1dc] ss:$16 sps:$4 sm:$0xff]  }
  0x3f   :  { %428 = vmatprep.subr.bf16.mxu0 %v1914_v26  ;;  %388 = vmatpush1.bf16.msra.mxu1 %v1915_v28  ;;  %v1957_v26 = vld [vmem:[#allocation3 + $0x1bc] ss:$16 sps:$4 sm:$0xff]   ;;  %v1955_v28 = vld [vmem:[#allocation3 + $0x1b8] ss:$16 sps:$4 sm:$0xff]  }
  0x40   :  { %389 = vmatprep.subr.bf16.mxu1 %v1916_v29  ;;  %v1960_v29 = vld [vmem:[#allocation3 + $0x194] ss:$16 sps:$4 sm:$0xff]  }
  0x42   :  { %429 = vmatpush1.bf16.msra.mxu0 %v1912_v27  ;;  %v1952_v27 = vld [vmem:[#allocation3 + $0x1b0] ss:$16 sps:$4 sm:$0xff]  }
  0x43   :  { %430 = vmatprep.subr.bf16.mxu0 %v1920_v30  ;;  %390 = vmatpush1.bf16.msra.mxu1 %v1921_v32  ;;  %v1963_v30 = vld [vmem:[#allocation3 + $0x19c] ss:$16 sps:$4 sm:$0xff]   ;;  %v1961_v32 = vld [vmem:[#allocation3 + $0x198] ss:$16 sps:$4 sm:$0xff]  }
  0x44   :  { %391 = vmatprep.subr.bf16.mxu1 %v1922_v33  ;;  %v1966_v33 = vld [vmem:[#allocation3 + $0x174] ss:$16 sps:$4 sm:$0xff]  }
  0x46   :  { %431 = vmatpush1.bf16.msra.mxu0 %v1918_v31  ;;  %v1958_v31 = vld [vmem:[#allocation3 + $0x190] ss:$16 sps:$4 sm:$0xff]  }
  0x47   :  { %432 = vmatprep.subr.bf16.mxu0 %v1926_v34  ;;  %392 = vmatpush1.bf16.msra.mxu1 %v1927_v36  ;;  %v1969_v34 = vld [vmem:[#allocation3 + $0x17c] ss:$16 sps:$4 sm:$0xff]   ;;  %v1967_v36 = vld [vmem:[#allocation3 + $0x178] ss:$16 sps:$4 sm:$0xff]  }
  0x48   :  { %1628 = vmatprep.subr.msk.bf16.mxu1 %vm86_vm1, %v1625_v39  ;;  %v1970_v39 = vld [vmem:[#allocation3 + $0x150] ss:$16 sps:$4 sm:$0xff]  }
  0x4a   :  { %433 = vmatpush1.bf16.msra.mxu0 %v1924_v35  ;;  %v1964_v35 = vld [vmem:[#allocation3 + $0x170] ss:$16 sps:$4 sm:$0xff]  }
  0x4b   :  { %1630 = vmatprep.subr.msk.bf16.mxu0 %vm86_vm1, %v1627_v40  ;;  %408 = vmatpush2.bf16.msra.mxu1 %v366_v43  ;;  %v1973_v40 = vld [vmem:[#allocation3 + $0x158] ss:$16 sps:$4 sm:$0xff]   ;;  %v1976_v43 = vld [vmem:[#allocation3 + $0x130] ss:$16 sps:$4 sm:$0xff]  }
  0x4c   :  { %1791 = vmatprep.subr.bf16.mxu1 %v2163_v0 }
  0x4e   :  { %449 = vmatpush2.bf16.msra.mxu0 %v372_v44  ;;  %v1979_v44 = vld [vmem:[#allocation3 + $0x138] ss:$16 sps:$4 sm:$0xff]  }
  0x4f   :  { %823 = vmatprep.subr.bf16.mxu0 %v1942_v1 }
  0xed   :  { %v124_v48 = vpop.f32.mrf.mxu0 }
  0xee   :  { %v125_v49 = vadd.f32 %v1590_v47, %v124_v48  ;;  %v1987_v47 = vld [vmem:[#allocation3 + $0x11c] ss:$16 sps:$4 sm:$0xff]   ;;  %v1982_v48 = vld [vmem:[#allocation3 + $0x110] ss:$16 sps:$4 sm:$0xff]  }
  0xef   :  { %v1789_v50 = vpop.f32.mrf.mxu0 }
  0xf0   :  { %v2245_v51 = vmax.f32 %v125_v49, 0.0  ;;  %v1985_v49 = vld [vmem:[#allocation3 + $0x118] ss:$16 sps:$4 sm:$0xff]   ;;  %v613_v50 = vld [vmem:[#allocation3 + $0x210] sm:$0xff] }
  0xf1   :  { %v127_v52 = vpop.f32.mrf.mxu0 }
  0xf2   :  { %v134_v54 = vpack.c.bf16 %v2245_v51, %v2245_v51  ;;  %v614_v52 = vld [vmem:[#allocation3 + $0x218] sm:$0xff] }
  0xf3   :  { %v1790_v55 = vpop.f32.mrf.mxu0 }
  0xf4   :  { %410 = vmatmul.mubr.bf16.vlgmr.msra.gmra.mxu1 %v134_v54  ;;  %451 = vmatmul.mubr.bf16.vlgmr.msra.gmra.mxu0 %v134_v54  ;;  %v1676_v54 = vcombine.high %v614_v52, %v614_v52  ;;  %v1673_v55 = vcombine.low %v613_v50, %v613_v50 }
  0xf5   :  { %1792 = vmatpush3.bf16.msra.mxu1 %v1932_v53  ;;  %1807 = vmatprep.mubr.msk.bf16.mxu1 %vm2164_vm0, %v2163_v0  ;;  %v1674_v53 = vcombine.high %v613_v50, %v613_v50  ;;  %v2017_v50 = vld [vmem:[#allocation3 + $0x2cc] ss:$16 sps:$4 sm:$0xff]  }
  0xf6   :  { %1793 = vmatprep.subr.bf16.mxu1 %v2163_v0  ;;  %1678 = vmatprep.mubr.msk.bf16.mxu0 %vm72_vm2, %v2235_v46 }
  0xf7   :  { %824 = vmatpush1.bf16.msra.mxu0 %v1940_v63 }
  0xf8   :  { %825 = vmatprep.subr.bf16.mxu0 %v1948_v3 }
  0xf9   :  { %1794 = vmatpush3.bf16.msra.mxu1 %v1933_v56  ;;  %v1675_v56 = vcombine.low %v614_v52, %v614_v52  ;;  %v2012_v52 = vld [vmem:[#allocation3 + $0x2c0] ss:$16 sps:$4 sm:$0xff]  }
  0xfa   :  { %1795 = vmatprep.subr.bf16.mxu1 %v2163_v0 }
  0xfb   :  { %826 = vmatpush1.bf16.msra.mxu0 %v1946_v4 }
  0xfc   :  { %827 = vmatprep.subr.bf16.mxu0 %v1954_v25  ;;  %v1999_v25 = vld [vmem:[#allocation5 + $0x40] sm:$0xff]  }
  0xfd   :  { %1796 = vmatpush3.bf16.msra.mxu1 %v1934_v57  ;;  %v812_v57 = vsel %vm86_vm1, %v1673_v55, 0  ;;  %v2023_v55 = vld [vmem:[#allocation3 + $0x2ac] ss:$16 sps:$4 sm:$0xff]  }
  0xfe   :  { %1797 = vmatprep.subr.bf16.mxu1 %v2163_v0 }
  0xff   :  { %828 = vmatpush1.bf16.msra.mxu0 %v1952_v27  ;;  %v2002_v27 = vld [vmem:[#allocation3 + $0x304] ss:$16 sps:$4 sm:$0xff]  }
 0x100   :  { %829 = vmatprep.subr.bf16.mxu0 %v1960_v29  ;;  %v2008_v29 = vld [vmem:[#allocation3 + $0x2e4] ss:$16 sps:$4 sm:$0xff]  }
 0x101   :  { %1798 = vmatpush3.bf16.msra.mxu1 %v1935_v58  ;;  %v818_v58 = vsel %vm86_vm1, %v1675_v56, 0  ;;  %v2018_v56 = vld [vmem:[#allocation3 + $0x2a0] ss:$16 sps:$4 sm:$0xff]  }
 0x102   :  { %1799 = vmatprep.subr.bf16.mxu1 %v2163_v0 }
 0x103   :  { %830 = vmatpush1.bf16.msra.mxu0 %v1958_v31  ;;  %v2323_v31 = vld [vmem:[%s2394_s5 + $0x4] sm:$0xf] }
 0x104   :  { %831 = vmatprep.subr.bf16.mxu0 %v1966_v33 }
 0x105   :  { %1800 = vmatpush3.bf16.msra.mxu1 %v1936_v59  ;;  %v2287_v59 = vsub.s32 1, %v2260_v6 }
 0x106   :  { %1801 = vmatprep.subr.bf16.mxu1 %v2163_v0 }
 0x107   :  { %832 = vmatpush1.bf16.msra.mxu0 %v1964_v35 }
 0x108   :  { %833 = vmatprep.subr.bf16.mxu0 %v1972_v37 }
 0x109   :  { %1802 = vmatpush3.bf16.msra.mxu1 %v1937_v60  ;;  %v2290_v60 = vsub.s32 0, %v2260_v6 }
 0x10a   :  { %1803 = vmatprep.subr.bf16.mxu1 %v2163_v0 }
 0x10b   :  { %834 = vmatpush1.bf16.msra.mxu0 %v1970_v39  ;;  %v175_v63 = vrot.slane %v2268_v8, %v2290_v60 }
 0x10c   :  { %835 = vmatprep.subr.bf16.mxu0 %v1978_v41 }
 0x10d   :  { %1804 = vmatpush3.bf16.msra.mxu1 %v1938_v61  ;;  %v179_v61 = vrot.slane %v2268_v8, %v2287_v59 }
 0x10e   :  { %1805 = vmatprep.subr.bf16.mxu1 %v2163_v0 }
 0x10f   :  { %836 = vmatpush1.bf16.msra.mxu0 %v1976_v43 }
 0x110   :  { %837 = vmatprep.subr.bf16.mxu0 %v1984_v45 }
 0x111   :  { %1806 = vmatpush3.bf16.msra.mxu1 %v1939_v62  ;;  %v2295_v62 = vsub.s32 3, %v2260_v6 }
 0x112   :  { %864 = vmatprep.subr.bf16.mxu1 %v1945_v2 }
 0x113   :  { %838 = vmatpush1.bf16.msra.mxu0 %v1982_v48  ;;  %v187_v2 = vrot.slane %v2268_v8, %v2295_v62  ;;  %v2009_v48 = vld [vmem:[#allocation3 + $0x2e8] ss:$16 sps:$4 sm:$0xff]  }
 0x114   :  { %1677 = vmatprep.subr.msk.bf16.mxu0 %vm86_vm1, %v1674_v53  ;;  %v2015_v53 = vld [vmem:[#allocation3 + $0x2c8] ss:$16 sps:$4 sm:$0xff]  }
 0x117   :  { %854 = vmatpush2.bf16.msra.mxu0 %v812_v57  ;;  %v2021_v57 = vld [vmem:[#allocation3 + $0x2a8] ss:$16 sps:$4 sm:$0xff]  }
 0x118   :  { %1811 = vmatprep.subr.bf16.mxu0 %v2163_v0 }
 0x1b4   :  { %v2272_v10 = vpop.f32.mrf.mxu1  ;;  %v452_v11 = vpop.f32.mrf.mxu0 }
 0x1b5   :  { %v453_v12 = vadd.f32 %v452_v11, %v183_v9  ;;  %v412_v3 = vadd.f32 %v2272_v10, %v175_v63  ;;  %v1992_v10 = vld [vmem:[#allocation5 + $0x78] sm:$0xff]  }
 0x1b6   :  { %v2274_v13 = vpop.f32.mrf.mxu1  ;;  %v2276_v14 = vpop.f32.mrf.mxu0  ;;  %v2027_v63 = vld [vmem:[#allocation3 + $0x288] ss:$16 sps:$4 sm:$0xff]  }
 0x1b7   :  { %2068 = vtanh.f32 %v453_v12  ;;  %v414_v1 = vadd.f32 %v2274_v13, %v179_v61  ;;  %v455_v4 = vadd.f32 %v2276_v14, %v187_v2  ;;  %v2024_v61 = vld [vmem:[#allocation3 + $0x280] ss:$16 sps:$4 sm:$0xff]   ;;  %v2035_v2 = vld [vmem:[#allocation3 + $0x26c] ss:$16 sps:$4 sm:$0xff]  }
 0x1b8   :  { %v415_v15 = vpop.f32.mrf.mxu1  ;;  %v456_v16 = vpop.f32.mrf.mxu0 }
 0x1b9   :  { %2070 = vtanh.f32 %v414_v1  ;;  %v2032_v1 = vld [vmem:[#allocation3 + $0x264] ss:$16 sps:$4 sm:$0xff]  }
 0x1ba   :  { %v416_v17 = vpop.f32.mrf.mxu1  ;;  %v457_v18 = vpop.f32.mrf.mxu0  ;;  %2072 = vtanh.f32 %v412_v3  ;;  %v2030_v3 = vld [vmem:[#allocation3 + $0x260] ss:$16 sps:$4 sm:$0xff]  }
 0x1c4   :  { %v2069_v19 = vpop.eup %2068 }
 0x1c5   :  { %v463_v20 = vmul.f32 %v2069_v19, %v2245_v51 }
 0x1c6   :  { %v2071_v15 = vpop.eup %2070 }
 0x1c7   :  { %v464_v22 = vpack.c.bf16 %v463_v20, %v463_v20  ;;  %v2073_v16 = vpop.eup %2072  ;;  %v571_v17 = vsub.f32 1.0, %v2071_v15  ;;  %v1993_v20 = vld [vmem:[#allocation5 + $0x70] sm:$0xff]   ;;  %v2047_v15 = vld [vmem:[#allocation3 + $0x22c] ss:$16 sps:$4 sm:$0xff]  }
 0x1c8   :  { %v573_v13 = vmul.f32 %v2073_v16, %v2245_v51  ;;  %v1994_v51 = vld [vmem:[#allocation5 + $0x68] sm:$0xff]   ;;  %v2042_v16 = vld [vmem:[#allocation3 + $0x220] ss:$16 sps:$4 sm:$0xff]  }
 0x1c9   :  { %1808 = vmatmul.mubr.bf16.vlgmr.msra.gmra.mxu1 %v464_v22  ;;  %v1996_v22 = vld [vmem:[#allocation5 + $0x58] sm:$0xff]  }
 0x1ca   :  { %865 = vmatpush1.bf16.msra.mxu1 %v1943_v21  ;;  %1680 = vmatprep.mubr.msk.bf16.mxu1 %vm72_vm2, %v2235_v46  ;;  %v1995_v21 = vld [vmem:[#allocation5 + $0x60] sm:$0xff]  }
 0x1cb   :  { %866 = vmatprep.subr.bf16.mxu1 %v1951_v23  ;;  %v1997_v23 = vld [vmem:[#allocation5 + $0x50] sm:$0xff]  }
 0x1ce   :  { %867 = vmatpush1.bf16.msra.mxu1 %v1949_v24  ;;  %v1998_v24 = vld [vmem:[#allocation5 + $0x48] sm:$0xff]  }
 0x1cf   :  { %868 = vmatprep.subr.bf16.mxu1 %v1957_v26  ;;  %v2000_v26 = vld [vmem:[#allocation3 + $0x300] ss:$16 sps:$4 sm:$0xff]  }
 0x1d2   :  { %869 = vmatpush1.bf16.msra.mxu1 %v1955_v28  ;;  %v2005_v28 = vld [vmem:[#allocation3 + $0x30c] ss:$16 sps:$4 sm:$0xff]  }
 0x1d3   :  { %870 = vmatprep.subr.bf16.mxu1 %v1963_v30  ;;  %v2006_v30 = vld [vmem:[#allocation3 + $0x2e0] ss:$16 sps:$4 sm:$0xff]  }
 0x1d6   :  { %871 = vmatpush1.bf16.msra.mxu1 %v1961_v32  ;;  %v629_v32 = vrot.slane %v2323_v31, %v2263_v7 }
 0x1d7   :  { %872 = vmatprep.subr.bf16.mxu1 %v1969_v34 }
 0x1da   :  { %873 = vmatpush1.bf16.msra.mxu1 %v1967_v36 }
 0x1db   :  { %874 = vmatprep.subr.bf16.mxu1 %v1975_v38 }
 0x1de   :  { %875 = vmatpush1.bf16.msra.mxu1 %v1973_v40 }
 0x1df   :  { %876 = vmatprep.subr.bf16.mxu1 %v1981_v42 }
 0x1e2   :  { %877 = vmatpush1.bf16.msra.mxu1 %v1979_v44  ;;  %v2003_v44 = vld [vmem:[#allocation3 + $0x308] ss:$16 sps:$4 sm:$0xff]  }
 0x1e3   :  { %878 = vmatprep.subr.bf16.mxu1 %v1987_v47  ;;  %v2011_v47 = vld [vmem:[#allocation3 + $0x2ec] ss:$16 sps:$4 sm:$0xff]  }
 0x1e6   :  { %879 = vmatpush1.bf16.msra.mxu1 %v1985_v49  ;;  %v2014_v49 = vld [vmem:[#allocation3 + $0x2c4] ss:$16 sps:$4 sm:$0xff]  }
 0x1e7   :  { %1679 = vmatprep.subr.msk.bf16.mxu1 %vm86_vm1, %v1676_v54  ;;  %v2020_v54 = vld [vmem:[#allocation3 + $0x2a4] ss:$16 sps:$4 sm:$0xff]  }
 0x1ea   :  { %895 = vmatpush2.bf16.msra.mxu1 %v818_v58  ;;  %v2026_v58 = vld [vmem:[#allocation3 + $0x284] ss:$16 sps:$4 sm:$0xff]  }
 0x1eb   :  { %1270 = vmatprep.subr.bf16.mxu1 %v2002_v27 }
 0x289   :  { %v563_v5 = vpop.f32.mrf.mxu1 }
 0x28a   :  { %v569_v9 = vadd.f32 %v563_v5, %v455_v4  ;;  %v2033_v4 = vld [vmem:[#allocation3 + $0x268] ss:$16 sps:$4 sm:$0xff]   ;;  %v2038_v5 = vld [vmem:[#allocation3 + $0x244] ss:$16 sps:$4 sm:$0xff]  }
 0x28b   :  { %v1809_v11 = vpop.f32.mrf.mxu1 }
 0x28c   :  { %2074 = vtanh.f32 %v569_v9  ;;  %v2041_v9 = vld [vmem:[#allocation3 + $0x24c] ss:$16 sps:$4 sm:$0xff]   ;;  %v2036_v11 = vld [vmem:[#allocation3 + $0x240] ss:$16 sps:$4 sm:$0xff]  }
 0x28d   :  { %v566_v6 = vpop.f32.mrf.mxu1 }
 0x28e   :  { %v2039_v6 = vld [vmem:[#allocation3 + $0x248] ss:$16 sps:$4 sm:$0xff]  }
 0x28f   :  { %v1810_v12 = vpop.f32.mrf.mxu1 }
 0x290   :  { %v2044_v12 = vld [vmem:[#allocation3 + $0x224] ss:$16 sps:$4 sm:$0xff]  }
 0x299   :  { %v2075_v18 = vpop.eup %2074 }
 0x29a   :  { %v572_v19 = vmul.f32 %v2075_v18, %v571_v17  ;;  %v2045_v17 = vld [vmem:[#allocation3 + $0x228] ss:$16 sps:$4 sm:$0xff]   ;;  %v1060_v18 = vld [vmem:[#allocation3 + $0x320] sm:$0xff] }
 0x29c   :  { %v2305_v8 = vadd.f32 %v573_v13, %v572_v19  ;;  %v1061_v13 = vld [vmem:[#allocation3 + $0x328] sm:$0xff]  ;;  %v1723_v19 = vcombine.high %v1060_v18, %v1060_v18 }
 0x29e   :  { %v578_v14 = vpack.c.bf16 %v2305_v8, %v2305_v8 }
 0x2a0   :  { %856 = vmatmul.mubr.bf16.vlgmr.msra.gmra.mxu0 %v578_v14  ;;  %897 = vmatmul.mubr.bf16.vlgmr.msra.gmra.mxu1 %v578_v14  ;;  %v1722_v14 = vcombine.low %v1060_v18, %v1060_v18 }
 0x2a1   :  { %1812 = vmatpush3.bf16.msra.mxu0 %v1992_v10  ;;  %1827 = vmatprep.mubr.msk.bf16.mxu0 %vm2164_vm0, %v2163_v0  ;;  %v1725_v10 = vcombine.high %v1061_v13, %v1061_v13 }
 0x2a2   :  { %1813 = vmatprep.subr.bf16.mxu0 %v2163_v0  ;;  %1727 = vmatprep.mubr.msk.bf16.mxu1 %vm72_vm2, %v2235_v46 }
 0x2a3   :  { %1271 = vmatpush1.bf16.msra.mxu1 %v2000_v26 }
 0x2a4   :  { %1272 = vmatprep.subr.bf16.mxu1 %v2008_v29 }
 0x2a5   :  { %1814 = vmatpush3.bf16.msra.mxu0 %v1993_v20  ;;  %v1724_v20 = vcombine.low %v1061_v13, %v1061_v13 }
 0x2a6   :  { %1815 = vmatprep.subr.bf16.mxu0 %v2163_v0 }
 0x2a7   :  { %1273 = vmatpush1.bf16.msra.mxu1 %v2006_v30 }
 0x2a8   :  { %1274 = vmatprep.subr.bf16.mxu1 %v2014_v49  ;;  %v1689_v49 = vld [vmem:[%s2394_s5 + $0x8] sm:$0xf] }
 0x2a9   :  { %1816 = vmatpush3.bf16.msra.mxu0 %v1994_v51  ;;  %v1259_v51 = vsel %vm86_vm1, %v1722_v14, 0  ;;  %v1080_v18 = vrot.slane %v1689_v49, %v2295_v62 }
 0x2aa   :  { %1817 = vmatprep.subr.bf16.mxu0 %v2163_v0 }
 0x2ab   :  { %1275 = vmatpush1.bf16.msra.mxu1 %v2012_v52 }
 0x2ac   :  { %1276 = vmatprep.subr.bf16.mxu1 %v2020_v54 }
 0x2ad   :  { %1818 = vmatpush3.bf16.msra.mxu0 %v1995_v21  ;;  %v1265_v21 = vsel %vm86_vm1, %v1724_v20, 0 }
 0x2ae   :  { %1819 = vmatprep.subr.bf16.mxu0 %v2163_v0 }
 0x2af   :  { %1277 = vmatpush1.bf16.msra.mxu1 %v2018_v56 }
 0x2b0   :  { %1278 = vmatprep.subr.bf16.mxu1 %v2026_v58 }
 0x2b1   :  { %1820 = vmatpush3.bf16.msra.mxu0 %v1996_v22  ;;  %v625_v22 = vrot.slane %v2323_v31, %v2287_v59 }
 0x2b2   :  { %1821 = vmatprep.subr.bf16.mxu0 %v2163_v0 }
 0x2b3   :  { %1279 = vmatpush1.bf16.msra.mxu1 %v2024_v61 }
 0x2b4   :  { %1280 = vmatprep.subr.bf16.mxu1 %v2032_v1 }
 0x2b5   :  { %1822 = vmatpush3.bf16.msra.mxu0 %v1997_v23  ;;  %v621_v23 = vrot.slane %v2323_v31, %v2290_v60 }
 0x2b6   :  { %1823 = vmatprep.subr.bf16.mxu0 %v2163_v0 }
 0x2b7   :  { %1281 = vmatpush1.bf16.msra.mxu1 %v2030_v3  ;;  %v2060_v3 = vld [vmem:[#allocation7 + $0x38] sm:$0xff]  }
 0x2b8   :  { %1282 = vmatprep.subr.bf16.mxu1 %v2038_v5  ;;  %v2063_v5 = vld [vmem:[#allocation7 + $0x20] sm:$0xff]  }
 0x2b9   :  { %1824 = vmatpush3.bf16.msra.mxu0 %v1998_v24 }
 0x2ba   :  { %1825 = vmatprep.subr.bf16.mxu0 %v2163_v0 }
 0x2bb   :  { %1283 = vmatpush1.bf16.msra.mxu1 %v2036_v11  ;;  %v2065_v11 = vld [vmem:[#allocation7 + $0x10] sm:$0xff]  }
 0x2bc   :  { %1284 = vmatprep.subr.bf16.mxu1 %v2044_v12  ;;  %v2067_v12 = vld [vmem:[#allocation7] sm:$0xff]  }
 0x2bd   :  { %1826 = vmatpush3.bf16.msra.mxu0 %v1999_v25  ;;  %v633_v25 = vrot.slane %v2323_v31, %v2295_v62  ;;  %v1738_v62 = vld [vmem:[%s2396_s7] ss:$0 sm:$0xff] }
 0x2be   :  { %1311 = vmatprep.subr.bf16.mxu0 %v2005_v28 }
 0x2bf   :  { %1285 = vmatpush1.bf16.msra.mxu1 %v2042_v16  ;;  %v1068_v16 = vrot.slane %v1689_v49, %v2290_v60 }
 0x2c0   :  { %1726 = vmatprep.subr.msk.bf16.mxu1 %vm86_vm1, %v1723_v19 }
 0x2c3   :  { %1301 = vmatpush2.bf16.msra.mxu1 %v1259_v51 }
 0x2c4   :  { %1831 = vmatprep.subr.bf16.mxu1 %v2163_v0 }
 0x360   :  { %v2327_v33 = vpop.f32.mrf.mxu0  ;;  %v898_v34 = vpop.f32.mrf.mxu1 }
 0x361   :  { %v899_v35 = vadd.f32 %v898_v34, %v629_v32  ;;  %v858_v26 = vadd.f32 %v2327_v33, %v621_v23  ;;  %v2052_v33 = vld [vmem:[#allocation5 + $0xb8] sm:$0xff]  }
 0x362   :  { %v2329_v36 = vpop.f32.mrf.mxu0  ;;  %v2331_v37 = vpop.f32.mrf.mxu1 }
 0x363   :  { %2076 = vtanh.f32 %v899_v35  ;;  %v860_v24 = vadd.f32 %v2329_v36, %v625_v22  ;;  %v901_v27 = vadd.f32 %v2331_v37, %v633_v25 }
 0x364   :  { %v861_v38 = vpop.f32.mrf.mxu0  ;;  %v902_v39 = vpop.f32.mrf.mxu1 }
 0x365   :  { %2078 = vtanh.f32 %v860_v24 }
 0x366   :  { %v862_v40 = vpop.f32.mrf.mxu0  ;;  %v903_v41 = vpop.f32.mrf.mxu1  ;;  %2080 = vtanh.f32 %v858_v26 }
 0x370   :  { %v2077_v42 = vpop.eup %2076 }
 0x371   :  { %v909_v43 = vmul.f32 %v2077_v42, %v2305_v8  ;;  %v2053_v42 = vld [vmem:[#allocation5 + $0xb0] sm:$0xff]  }
 0x372   :  { %v2079_v35 = vpop.eup %2078 }
 0x373   :  { %v910_v45 = vpack.c.bf16 %v909_v43, %v909_v43  ;;  %v2081_v38 = vpop.eup %2080  ;;  %v1018_v39 = vsub.f32 1.0, %v2079_v35  ;;  %v2055_v43 = vld [vmem:[#allocation5 + $0xa0] sm:$0xff]  }
 0x374   :  { %v1020_v36 = vmul.f32 %v2081_v38, %v2305_v8  ;;  %v2054_v8 = vld [vmem:[#allocation5 + $0xa8] sm:$0xff]  }
 0x375   :  { %1828 = vmatmul.mubr.bf16.vlgmr.msra.gmra.mxu0 %v910_v45  ;;  %v2057_v45 = vld [vmem:[#allocation5 + $0x90] sm:$0xff]  }
 0x376   :  { %1312 = vmatpush1.bf16.msra.mxu0 %v2003_v44  ;;  %1729 = vmatprep.mubr.msk.bf16.mxu0 %vm72_vm2, %v2235_v46  ;;  %v2029_v46 = vld [vmem:[#allocation3 + $0x28c] ss:$16 sps:$4 sm:$0xff]  }
 0x377   :  { %1313 = vmatprep.subr.bf16.mxu0 %v2011_v47  ;;  %v2056_v44 = vld [vmem:[#allocation5 + $0x98] sm:$0xff]   ;;  %v2058_v47 = vld [vmem:[#allocation5 + $0x88] sm:$0xff]  }
 0x37a   :  { %1314 = vmatpush1.bf16.msra.mxu0 %v2009_v48  ;;  %v2059_v48 = vld [vmem:[#allocation5 + $0x80] sm:$0xff]  }
 0x37b   :  { %1315 = vmatprep.subr.bf16.mxu0 %v2017_v50  ;;  %v1076_v50 = vrot.slane %v1689_v49, %v2263_v7  ;;  %v2061_v7 = vld [vmem:[#allocation7 + $0x30] sm:$0xff]  }
 0x37e   :  { %1316 = vmatpush1.bf16.msra.mxu0 %v2015_v53 }
 0x37f   :  { %1317 = vmatprep.subr.bf16.mxu0 %v2023_v55 }
 0x382   :  { %1318 = vmatpush1.bf16.msra.mxu0 %v2021_v57 }
 0x383   :  { %1319 = vmatprep.subr.bf16.mxu0 %v2029_v46 }
 0x386   :  { %1320 = vmatpush1.bf16.msra.mxu0 %v2027_v63 }
 0x387   :  { %1321 = vmatprep.subr.bf16.mxu0 %v2035_v2 }
 0x38a   :  { %1322 = vmatpush1.bf16.msra.mxu0 %v2033_v4  ;;  %v2062_v4 = vld [vmem:[#allocation7 + $0x28] sm:$0xff]  }
 0x38b   :  { %1323 = vmatprep.subr.bf16.mxu0 %v2041_v9  ;;  %v2064_v9 = vld [vmem:[#allocation7 + $0x18] sm:$0xff]  }
 0x38e   :  { %1324 = vmatpush1.bf16.msra.mxu0 %v2039_v6  ;;  %v2066_v6 = vld [vmem:[#allocation7 + $0x8] sm:$0xff]  }
 0x38f   :  { %1325 = vmatprep.subr.bf16.mxu0 %v2047_v15  ;;  %v1072_v15 = vrot.slane %v1689_v49, %v2287_v59 }
 0x392   :  { %1326 = vmatpush1.bf16.msra.mxu0 %v2045_v17 }
 0x393   :  { %1728 = vmatprep.subr.msk.bf16.mxu0 %vm86_vm1, %v1725_v10 }
 0x396   :  { %1342 = vmatpush2.bf16.msra.mxu0 %v1265_v21 }
 0x397   :  { %1851 = vmatprep.subr.bf16.mxu0 %v2163_v0 }
 0x435   :  { %v1010_v28 = vpop.f32.mrf.mxu0 }
 0x436   :  { %v1016_v29 = vadd.f32 %v1010_v28, %v901_v27 }
 0x437   :  { %v1829_v30 = vpop.f32.mrf.mxu0 }
 0x438   :  { %2082 = vtanh.f32 %v1016_v29 }
 0x439   :  { %v1013_v32 = vpop.f32.mrf.mxu0 }
 0x43b   :  { %v1830_v34 = vpop.f32.mrf.mxu0 }
 0x445   :  { %v2083_v40 = vpop.eup %2082 }
 0x446   :  { %v1019_v41 = vmul.f32 %v2083_v40, %v1018_v39 }
 0x448   :  { %v2352_v31 = vadd.f32 %v1020_v36, %v1019_v41 }
 0x44a   :  { %v1025_v37 = vpack.c.bf16 %v2352_v31, %v2352_v31 }
 0x44c   :  { %1303 = vmatmul.mubr.bf16.vlgmr.msra.gmra.mxu1 %v1025_v37  ;;  %1344 = vmatmul.mubr.bf16.vlgmr.msra.gmra.mxu0 %v1025_v37 }
 0x44d   :  { %1832 = vmatpush3.bf16.msra.mxu1 %v2052_v33  ;;  %1847 = vmatprep.mubr.msk.bf16.mxu1 %vm2164_vm0, %v2163_v0 }
 0x44e   :  { %1833 = vmatprep.subr.bf16.mxu1 %v2163_v0  ;;  %1867 = vmatprep.mubr.msk.bf16.mxu0 %vm2164_vm0, %v2163_v0 }
 0x44f   :  { %1852 = vmatpush3.bf16.msra.mxu0 %v2060_v3 }
 0x450   :  { %1853 = vmatprep.subr.bf16.mxu0 %v2163_v0 }
 0x451   :  { %1834 = vmatpush3.bf16.msra.mxu1 %v2053_v42 }
 0x452   :  { %1835 = vmatprep.subr.bf16.mxu1 %v2163_v0 }
 0x453   :  { %1854 = vmatpush3.bf16.msra.mxu0 %v2061_v7 }
 0x454   :  { %1855 = vmatprep.subr.bf16.mxu0 %v2163_v0 }
 0x455   :  { %1836 = vmatpush3.bf16.msra.mxu1 %v2054_v8 }
 0x456   :  { %1837 = vmatprep.subr.bf16.mxu1 %v2163_v0 }
 0x457   :  { %1856 = vmatpush3.bf16.msra.mxu0 %v2062_v4 }
 0x458   :  { %1857 = vmatprep.subr.bf16.mxu0 %v2163_v0 }
 0x459   :  { %1838 = vmatpush3.bf16.msra.mxu1 %v2055_v43 }
 0x45a   :  { %1839 = vmatprep.subr.bf16.mxu1 %v2163_v0 }
 0x45b   :  { %1858 = vmatpush3.bf16.msra.mxu0 %v2063_v5 }
 0x45c   :  { %1859 = vmatprep.subr.bf16.mxu0 %v2163_v0 }
 0x45d   :  { %1840 = vmatpush3.bf16.msra.mxu1 %v2056_v44 }
 0x45e   :  { %1841 = vmatprep.subr.bf16.mxu1 %v2163_v0 }
 0x45f   :  { %1860 = vmatpush3.bf16.msra.mxu0 %v2064_v9 }
 0x460   :  { %1861 = vmatprep.subr.bf16.mxu0 %v2163_v0 }
 0x461   :  { %1842 = vmatpush3.bf16.msra.mxu1 %v2057_v45 }
 0x462   :  { %1843 = vmatprep.subr.bf16.mxu1 %v2163_v0 }
 0x463   :  { %1862 = vmatpush3.bf16.msra.mxu0 %v2065_v11 }
 0x464   :  { %1863 = vmatprep.subr.bf16.mxu0 %v2163_v0 }
 0x465   :  { %1844 = vmatpush3.bf16.msra.mxu1 %v2058_v47 }
 0x466   :  { %1845 = vmatprep.subr.bf16.mxu1 %v2163_v0 }
 0x467   :  { %1864 = vmatpush3.bf16.msra.mxu0 %v2066_v6 }
 0x468   :  { %1865 = vmatprep.subr.bf16.mxu0 %v2163_v0 }
 0x469   :  { %1846 = vmatpush3.bf16.msra.mxu1 %v2059_v48 }
 0x46b   :  { %1866 = vmatpush3.bf16.msra.mxu0 %v2067_v12 }
 0x50c   :  { %v1304_v52 = vpop.f32.mrf.mxu1  ;;  %v1345_v53 = vpop.f32.mrf.mxu0 }
 0x50d   :  { %v1346_v54 = vadd.f32 %v1345_v53, %v1076_v50  ;;  %v1305_v13 = vadd.f32 %v1304_v52, %v1068_v16 }
 0x50e   :  { %v1306_v55 = vpop.f32.mrf.mxu1  ;;  %v1347_v56 = vpop.f32.mrf.mxu0 }
 0x50f   :  { %2084 = vtanh.f32 %v1346_v54  ;;  %v1307_v17 = vadd.f32 %v1306_v55, %v1072_v15  ;;  %v1348_v19 = vadd.f32 %v1347_v56, %v1080_v18 }
 0x510   :  { %v1308_v57 = vpop.f32.mrf.mxu1  ;;  %v1349_v58 = vpop.f32.mrf.mxu0 }
 0x511   :  { %2086 = vtanh.f32 %v1307_v17 }
 0x512   :  { %v1309_v46 = vpop.f32.mrf.mxu1  ;;  %v1350_v61 = vpop.f32.mrf.mxu0  ;;  %2088 = vtanh.f32 %v1305_v13 }
 0x51c   :  { %v2085_v63 = vpop.eup %2084 }
 0x51d   :  { %v1356_v1 = vmul.f32 %v2085_v63, %v2352_v31 }
 0x51e   :  { %v2087_v0 = vpop.eup %2086 }
 0x51f   :  { %v1357_v2 = vpack.c.bf16 %v1356_v1, %v1356_v1  ;;  %v2089_v22 = vpop.eup %2088  ;;  %v1465_v23 = vsub.f32 1.0, %v2087_v0 }
 0x520   :  { %v1467_v59 = vmul.f32 %v2089_v22, %v2352_v31 }
 0x521   :  { %1848 = vmatmul.mubr.bf16.vlgmr.msra.gmra.mxu1 %v1357_v2 }
 0x5e1   :  { %v1457_v10 = vpop.f32.mrf.mxu1 }
 0x5e2   :  { %v1463_v14 = vadd.f32 %v1457_v10, %v1348_v19 }
 0x5e3   :  { %v1849_v20 = vpop.f32.mrf.mxu1 }
 0x5e4   :  { %2090 = vtanh.f32 %v1463_v14 }
 0x5e5   :  { %v1460_v51 = vpop.f32.mrf.mxu1 }
 0x5e7   :  { %v1850_v21 = vpop.f32.mrf.mxu1 }
 0x5f1   :  { %v2091_v24 = vpop.eup %2090 }
 0x5f2   :  { %v1466_v60 = vmul.f32 %v2091_v24, %v1465_v23 }
 0x5f4   :  { %v1468_v25 = vadd.f32 %v1467_v59, %v1466_v60 }
 0x5f6   :  { %v1471_v26 = vpack.c.bf16 %v1468_v25, %v1468_v25 }
 0x5f8   :  { %1868 = vmatmul.mubr.bf16.vlgmr.msra.gmra.mxu0 %v1471_v26 }
 0x6b8   :  { %v1577_v27 = vpop.f32.mrf.mxu0 }
 0x6b9   :  { %v1578_v28 = vadd.f32 %v1738_v62, %v1577_v27 }
 0x6ba   :  { %v1869_v29 = vpop.f32.mrf.mxu0 }
 0x6bb   :  { %1583 = vst [vmem:[%s2397_s8] sm:$0xff] %v1578_v28 }
 0x6bc   :  { %v1580_v30 = vpop.f32.mrf.mxu0 }
 0x6be   :  { %v1870_v32 = vpop.f32.mrf.mxu0 }
 0x6bf   :  { %1588 = vsyncpa [#allocation4], 1 }
 0x6c0   :  { %1589 = vsyncpa [#allocation6], 1 }

</bundles_post_ra>
